<compile_context>
chip_gen: v5e
topology: v5e:2x2
jax: 0.10.0
libtpu: 0.0.40
codegen_flags: <defaults>
</compile_context>

<pallas_src>
import jax
import jax.numpy as jnp
from jax.experimental import pallas as pl
from jax.experimental.pallas import tpu as pltpu


OUT_CHANNELS = 256

_MAX_TILE = 4096                              # lane (H*W) tile upper bound
_TARGET_STEPS = 4                             # >= 2x the v7x TensorCore count
_BIAS_VMEM = 2 * OUT_CHANNELS * 128 * 4       # (256,1) block lane-pads to (256,128), dbl-buf
_HEADROOM = 4 * 1024 * 1024                   # Mosaic internal scratch + misc

_VMEM_CACHE = None


def _vmem_limits():
    """(scoped_vmem_limit, tile_budget), generation-aware and cached."""
    global _VMEM_CACHE
    if _VMEM_CACHE is None:
        try:
            phys = int(pltpu.get_tpu_info().vmem_capacity_bytes)
        except Exception:
            phys = 64 * 1024 * 1024           # conservative fallback (v7x-sized)
        if phys >= 128 * 1024 * 1024:         # v5e / v6e: lots of physical headroom
            limit = 64 * 1024 * 1024
        else:                                 # v7x: 64 MiB physical -> stay at 32 MiB
            limit = 32 * 1024 * 1024
        _VMEM_CACHE = (limit, limit - _HEADROOM)
    return _VMEM_CACHE


def _pick_spatial_tile(hw, cap, n):
    """Pick the lane (H*W) tile; `cap` is the largest VMEM-feasible lane tile."""
    if hw <= cap:
        # One block would fit, but never let the grid collapse to 1-2 steps:
        # split so there is something to pipeline and shard across TensorCores.
        if n >= _TARGET_STEPS and n % 2 == 0:
            return hw                         # batch already provides the steps
        per_n = max(2, pl.cdiv(_TARGET_STEPS, n))
        if (n * per_n) % 2:
            per_n += 1                        # keep total step count even (v7x)
        t = ((pl.cdiv(hw, per_n) + 127) // 128) * 128
        return hw if t >= hw else t
    # hw > cap: prefer an exact 128-multiple divisor (no partial edge block),
    # and among those prefer an even total step count (v7x megacore balance).
    best = None
    for cand in range(cap, 127, -128):
        if hw % cand == 0:
            if (n * (hw // cand)) % 2 == 0:
                return cand
            if best is None:
                best = cand
    return best if best is not None else cap  # partial edge block (masked)


def _plan(n, cin, hw):
    """Static (shape-derived) tiling plan: (use_ktiling, tk, t_hw, vmem_limit)."""
    limit, budget = _vmem_limits()
    # --- resident-weight plan (no K tiling) ---
    resident = 2 * OUT_CHANNELS * cin * 4 + _BIAS_VMEM    # dbl-buffered W + padded bias
    per_lane = 2 * (cin + OUT_CHANNELS) * 4               # X + Y tiles, double-buffered
    avail = max(budget - resident, 0)
    cap = max(128, min(_MAX_TILE, (avail // per_lane) // 128 * 128))
    need_k = (avail // per_lane) < 512 and cin % 128 == 0 and cin > 512
    if not need_k:
        return False, cin, _pick_spatial_tile(hw, cap, n), limit
    # --- K-tiled plan: decouple the lane tile from a very large Cin ---
    tk = next(t for t in (2048, 1024, 512, 256, 128) if cin % t == 0)
    resident_k = 2 * OUT_CHANNELS * tk * 4 + _BIAS_VMEM
    per_lane_k = 2 * tk * 4 + 2 * OUT_CHANNELS * 4 + OUT_CHANNELS * 4   # X, Y dbl-buf + f32 acc
    avail_k = max(budget - resident_k, 0)
    cap_k = max(128, min(_MAX_TILE, (avail_k // per_lane_k) // 128 * 128))
    return True, tk, _pick_spatial_tile(hw, cap_k, n), limit


def _conv1x1_kernel(w_ref, b_ref, x_ref, o_ref):
    # w_ref: (256, Cin)  b_ref: (256, 1)  x_ref: (Cin, t_hw)  o_ref: (256, t_hw)
    acc = jnp.dot(w_ref[...], x_ref[...], preferred_element_type=jnp.float32)
    o_ref[...] = (acc + b_ref[...]).astype(o_ref.dtype)


def _conv1x1_kernel_ktiled(w_ref, b_ref, x_ref, o_ref, acc_ref):
    # w_ref: (256, tk)  x_ref: (tk, t_hw)  acc_ref: (256, t_hw) f32 scratch
    k = pl.program_id(2)

    @pl.when(k == 0)
    def _():
        acc_ref[...] = jnp.zeros_like(acc_ref)

    acc_ref[...] += jnp.dot(w_ref[...], x_ref[...],
                            preferred_element_type=jnp.float32)

    @pl.when(k == pl.num_programs(2) - 1)
    def _():
        o_ref[...] = (acc_ref[...] + b_ref[...]).astype(o_ref.dtype)


@jax.jit
def conv1x1_pallas(x_nchw, weight, bias):
    """1x1 conv, equivalent to nn.Conv2d(Cin, 256, kernel_size=1).

    x_nchw : (N, Cin, H, W) float32
    weight : (256, Cin)     float32   (squeezed from Conv2d's (256, Cin, 1, 1))
    bias   : (256,)         float32
    returns: (N, 256, H, W) float32
    """
    n, cin, h, w = x_nchw.shape
    hw = h * w
    use_k, tk, t_hw, vmem_limit = _plan(n, cin, hw)   # all static at trace time

    x_flat = x_nchw.reshape(n, cin, hw)               # contiguous -> free
    b_col = bias.reshape(OUT_CHANNELS, 1)

    cost = pl.CostEstimate(
        flops=2 * n * OUT_CHANNELS * cin * hw,
        transcendentals=0,
        bytes_accessed=(cin + OUT_CHANNELS) * n * hw * 4
        + OUT_CHANNELS * (cin + 1) * 4,
    )

    if not use_k:
        grid = (n, pl.cdiv(hw, t_hw))
        out = pl.pallas_call(
            _conv1x1_kernel,
            out_shape=jax.ShapeDtypeStruct((n, OUT_CHANNELS, hw), x_nchw.dtype),
            grid_spec=pltpu.PrefetchScalarGridSpec(
                num_scalar_prefetch=0,
                grid=grid,
                in_specs=[
                    pl.BlockSpec((OUT_CHANNELS, cin), lambda b, s: (0, 0)),   # W resident
                    pl.BlockSpec((OUT_CHANNELS, 1), lambda b, s: (0, 0)),     # bias resident
                    pl.BlockSpec((None, cin, t_hw), lambda b, s: (b, 0, s)),  # X tile
                ],
                out_specs=pl.BlockSpec(
                    (None, OUT_CHANNELS, t_hw), lambda b, s: (b, 0, s)),      # lane-dense out
            ),
            compiler_params=pltpu.CompilerParams(
                dimension_semantics=("parallel", "parallel"),
                vmem_limit_bytes=vmem_limit,
            ),
            cost_estimate=cost,
        )(weight, b_col, x_flat)
    else:
        # Very large Cin: K-tiled accumulation keeps t_hw large within VMEM.
        grid = (n, pl.cdiv(hw, t_hw), cin // tk)
        out = pl.pallas_call(
            _conv1x1_kernel_ktiled,
            out_shape=jax.ShapeDtypeStruct((n, OUT_CHANNELS, hw), x_nchw.dtype),
            grid_spec=pltpu.PrefetchScalarGridSpec(
                num_scalar_prefetch=0,
                grid=grid,
                in_specs=[
                    pl.BlockSpec((OUT_CHANNELS, tk), lambda b, s, k: (0, k)),    # W K-slab
                    pl.BlockSpec((OUT_CHANNELS, 1), lambda b, s, k: (0, 0)),     # bias resident
                    pl.BlockSpec((None, tk, t_hw), lambda b, s, k: (b, k, s)),   # X tile
                ],
                out_specs=pl.BlockSpec(
                    (None, OUT_CHANNELS, t_hw), lambda b, s, k: (b, 0, s)),
                scratch_shapes=[pltpu.VMEM((OUT_CHANNELS, t_hw), jnp.float32)],
            ),
            compiler_params=pltpu.CompilerParams(
                dimension_semantics=("parallel", "parallel", "arbitrary"),
                vmem_limit_bytes=vmem_limit,
            ),
            cost_estimate=cost,
        )(weight, b_col, x_flat)

    return out.reshape(n, OUT_CHANNELS, h, w)          # contiguous -> free


def init_params(key, in_channels):
    """Deterministic init matching Conv2d shapes: weight (256, Cin), bias = 0."""
    kw, _ = jax.random.split(key)
    fan_in = in_channels                               # kernel_size=1 -> fan_in = Cin
    bound = 1.0 / jnp.sqrt(jnp.float32(fan_in))
    weight = jax.random.uniform(
        kw, (OUT_CHANNELS, in_channels), dtype=jnp.float32,
        minval=-bound, maxval=bound)
    bias = jnp.zeros((OUT_CHANNELS,), dtype=jnp.float32)  # nn.init.constant_(bias, 0)
    return weight, bias


if __name__ == "__main__":
    key = jax.random.PRNGKey(0)
    k_x, k_p, k_b = jax.random.split(key, 3)

    batch, in_channels, spatial = 2, 4, 16
    x = jax.random.normal(k_x, (batch, in_channels, spatial, spatial),
                          dtype=jnp.float32)
    weight, bias = init_params(k_p, in_channels)
    # Module initializes bias to 0; use a nonzero bias here purely to exercise
    # the bias-add path in the correctness check (reference uses the same bias).
    bias = 0.1 * jax.random.normal(k_b, (OUT_CHANNELS,), dtype=jnp.float32)

    y = jax.block_until_ready(conv1x1_pallas(x, weight, bias))

    # Reference check against plain-JAX 1x1 conv (einsum over channels).
    y_ref = jnp.einsum("nchw,oc->nohw", x, weight) + bias[None, :, None, None]
    assert y.shape == (batch, OUT_CHANNELS, spatial, spatial)
    assert jnp.allclose(y, y_ref, atol=1e-5, rtol=1e-5)

    print("KERNEL_OK")
</pallas_src>

<mosaic_0001>
module attributes {stable_mosaic.version = 11 : i64} {
  func.func @_conv1x1_kernel(%arg0: i32, %arg1: i32, %arg2: memref<256x4xf32, #tpu.memory_space<vmem>>, %arg3: memref<256x1xf32, #tpu.memory_space<vmem>>, %arg4: memref<1x4x128xf32, #tpu.memory_space<vmem>>, %arg5: memref<1x256x128xf32, #tpu.memory_space<vmem>>) attributes {dimension_semantics = [#tpu.dimension_semantics<parallel>, #tpu.dimension_semantics<parallel>], iteration_bounds = array<i64: 2, 2>, scalar_prefetch = 0 : i64, scratch_operands = 0 : i64, tpu.core_type = #tpu.core_type<tc>, window_params = [{pipeline_mode = #tpu.pipeline_mode<synchronous>, transform_indices = @transform_0, window_bounds = array<i64: 256, 4>}, {pipeline_mode = #tpu.pipeline_mode<synchronous>, transform_indices = @transform_1, window_bounds = array<i64: 256, 1>}, {transform_indices = @transform_2, window_bounds = array<i64: 1, 4, 128>}, {transform_indices = @transform_3, window_bounds = array<i64: 1, 256, 128>}]} {
    %c0 = arith.constant 0 : index
    %c0_0 = arith.constant 0 : index
    %0 = vector.load %arg2[%c0, %c0_0] : memref<256x4xf32, #tpu.memory_space<vmem>>, vector<256x4xf32>
    %c0_1 = arith.constant 0 : index
    %c0_2 = arith.constant 0 : index
    %c0_3 = arith.constant 0 : index
    %1 = vector.load %arg4[%c0_1, %c0_2, %c0_3] : memref<1x4x128xf32, #tpu.memory_space<vmem>>, vector<1x4x128xf32>
    %2 = vector.shape_cast %1 : vector<1x4x128xf32> to vector<4x128xf32>
    %cst = arith.constant dense<0.000000e+00> : vector<256x128xf32>
    %3 = tpu.matmul %0, %2, %cst {dimension_numbers = #tpu.dot_dimension_numbers<[1], [0], [0], [1], [0, 0, 1, 1], [], []>} : vector<256x4xf32>, vector<4x128xf32>, vector<256x128xf32> -> vector<256x128xf32>
    %c0_4 = arith.constant 0 : index
    %c0_5 = arith.constant 0 : index
    %4 = vector.load %arg3[%c0_4, %c0_5] : memref<256x1xf32, #tpu.memory_space<vmem>>, vector<256x1xf32>
    %5 = vector.broadcast %4 : vector<256x1xf32> to vector<256x128xf32>
    %6 = arith.addf %3, %5 : vector<256x128xf32>
    %c0_6 = arith.constant 0 : index
    %c0_7 = arith.constant 0 : index
    %c0_8 = arith.constant 0 : index
    %7 = vector.load %arg5[%c0_6, %c0_7, %c0_8] : memref<1x256x128xf32, #tpu.memory_space<vmem>>, vector<1x256x128xf32>
    %8 = vector.shape_cast %7 : vector<1x256x128xf32> to vector<256x128xf32>
    %9 = vector.shape_cast %6 : vector<256x128xf32> to vector<1x256x128xf32>
    tpu.vector_store %arg5[%c0_6, %c0_7, %c0_8], %9 {strides = array<i32>} : memref<1x256x128xf32, #tpu.memory_space<vmem>>, vector<1x256x128xf32>,
    return
  }
  func.func @transform_0(%arg0: i32, %arg1: i32) -> (i32, i32) {
    %c0_i32 = arith.constant 0 : i32
    %c0_i32_0 = arith.constant 0 : i32
    %c0_i32_1 = arith.constant 0 : i32
    return %c0_i32, %c0_i32_0 : i32, i32
  }
  func.func @transform_1(%arg0: i32, %arg1: i32) -> (i32, i32) {
    %c0_i32 = arith.constant 0 : i32
    %c0_i32_0 = arith.constant 0 : i32
    %c0_i32_1 = arith.constant 0 : i32
    return %c0_i32, %c0_i32_0 : i32, i32
  }
  func.func @transform_2(%arg0: i32, %arg1: i32) -> (i32, i32, i32) {
    %c0_i32 = arith.constant 0 : i32
    %c0_i32_0 = arith.constant 0 : i32
    return %arg0, %c0_i32, %arg1 : i32, i32, i32
  }
  func.func @transform_3(%arg0: i32, %arg1: i32) -> (i32, i32, i32) {
    %c0_i32 = arith.constant 0 : i32
    %c0_i32_0 = arith.constant 0 : i32
    return %arg0, %c0_i32, %arg1 : i32, i32, i32
  }
}

</mosaic_0001>

<bundles_post_ra>
// kernel: conv1x1_pallas.1
= control target key start
LH: loop header
LB: loop body
LE: loop exit
PB: predicated region body
PF: predicated region fallthrough
CT: control target
= control target key end

     0   :  { %s1085_s12 = smov 0   ;;  %s1087_s13 = smov 0   ;;  %s1528_s0 = inlined_call_operand.vmem [shape: f32[256,4], index: 0, kind: input, shape index: {}]   ;;  %s1529_s1 = inlined_call_operand.vmem [shape: f32[256,1], index: 1, kind: input, shape index: {}]   ;;  %s1530_s2 = inlined_call_operand.vmem [shape: f32[2,4,256], index: 2, kind: input, shape index: {}]   ;;  %s1531_s3 = inlined_call_operand.vmem [shape: f32[2,256,256], index: 3, kind: output, shape index: {}]  }
   0x1   :  { %s1089_s14 = smov 0   ;;  %s1091_s15 = smov 0  }
   0x2   :  { %s1093_s16 = smov 0   ;;  %s1095_s17 = smov 0  }
   0x3   :  { %s1097_s18 = smov 0  }
   0x4 LB: > { %s22_s19 = sadd.s32 1, %s1054_s16  ;;  %s25_s20 = sadd.s32 1, %s1058_s17  ;;  %s1062_s18 = sphi %s1097_s18, %s13_s18   ;;  %s1058_s17 = sphi %s1095_s17, %s1538_s17   ;;  %s1054_s16 = sphi %s1093_s16, %s1537_s16   ;;  %s1050_s15 = sphi %s1091_s15, %s1536_s15   ;;  %s1046_s14 = sphi %s1089_s14, %s1535_s14   ;;  %s1042_s13 = sphi %s1087_s13, %s1534_s13   ;;  %s1038_s12 = sphi %s1085_s12, %s1533_s12  }
   0x5   : > { %p23_p0 = scmp.ge.s32.totalorder %s22_s19, 2  ;;  %s899_s21 = sadd.s32 4294967295, %s1062_s18  }
   0x6   : > { %p114_p1 = scmp.ne.s32.totalorder %s1042_s13, %s1038_s12  ;;  %p115_p2 = scmp.eq.s32.totalorder %s899_s21, 3 }
   0x7   : > { %s1540_s19 = smov (%p23_p0, %s22_s19), 0  ;;  %s1542_s20 = smov (!%p23_p0, %s25_s20), %s1058_s17 }
   0x8   : > { %s100_s22 = ssub.s32 %s1054_s16, %s1540_s19  ;;  %p27_p3 = scmp.ge.s32.totalorder %s1542_s20, 2 }
   0x9   : > { %p903_p4 = scmp.ge.s32.totalorder %s1062_s18, 1  ;;  %p1131_p5 = por %p115_p2, %p114_p1 }
   0xa   : > { %p156_p6 = scmp.lt.s32.totalorder %s1062_s18, 5  ;;  %s1544_s20 = smov (%p27_p3, %s1542_s20), 0 }
   0xb   : > { %s99_s24 = ssub.s32 %s1058_s17, %s1544_s20  ;;  %s104_s26 = sadd.s32 1, %s1042_s13 }
   0xc   : > { %p157_p7 = pnand %p903_p4, %p156_p6  ;;  %s101_s25 = sor.u32 %s100_s22, %s99_s24 }
   0xd   : > { %p102_p8 = scmp.eq.s32.totalorder %s101_s25, 0  ;;  %p182_p9 = scmp.lt.s32.totalorder (!%p157_p7), %s1050_s15, 1 }
   0xe   : > { %160 = sbr.rel (%p157_p7) target bundleno = 237 (0xed), region = 32  ;;  %p184_p10 = scmp.lt.s32.totalorder (!%p157_p7), %s1046_s14, 1 }
   0xf   : > { %s1142_s27 = scalar_select %p102_p8, %s1042_s13, %s104_s26  }
  0x13   : > { %v227_v0 = vld [vmem:[%s1529_s1 + $0x20] sm:$0xff]  ;;  %v225_v1 = vld [vmem:[%s1529_s1 + $0x10] sm:$0xff]  ;;  %v1064_v3 = vmov 0   ;;  %s183_s7 = scalar_select %p182_p9, %s1050_s15, 1  ;;  %vm512_vm0 = vcmask 1043456   ;;  %v228_v5 = vld [vmem:[%s1529_s1 + $0x28] sm:$0xff] }
  0x14   : > { %v223_v2 = vld [vmem:[%s1529_s1] sm:$0xff]  ;;  %1007 = vset.pattern.permute.xlu2 %v1064_v3  ;;  %1006 = vset.pattern.permute.xlu1 %v1064_v3  ;;  %s185_s8 = scalar_select %p184_p10, %s1046_s14, 1  ;;  %v226_v6 = vld [vmem:[%s1529_s1 + $0x18] sm:$0xff]  ;;  %v224_v7 = vld [vmem:[%s1529_s1 + $0x8] sm:$0xff]  ;;  %vm415_vm1 = vcmask 31744  }
  0x15   : > { %1005 = vset.pattern.permute.xlu0 %v1064_v3  ;;  %277 = vperm.xlu2 %1007, %v227_v0   ;;  %s905_s9 = sshll.u32 %s183_s7, 1  ;;  %v190_v8 = vld [vmem:[%s1528_s0] sm:$0xff]  ;;  %v230_v13 = vld [vmem:[%s1529_s1 + $0x38] sm:$0xff]  ;;  %v229_v14 = vld [vmem:[%s1529_s1 + $0x30] sm:$0xff] }
  0x16   : > { %267 = vperm.xlu1 %1006, %v225_v1   ;;  %257 = vperm.xlu0 %1005, %v223_v2   ;;  %s187_s10 = sadd.s32 %s905_s9, %s185_s8  ;;  %v198_v9 = vld [vmem:[%s1528_s0 + $0x40] sm:$0xff]  ;;  %v191_v15 = vld [vmem:[%s1528_s0 + $0x8] sm:$0xff]  ;;  %v234_v19 = vld [vmem:[%s1529_s1 + $0x58] sm:$0xff]  ;;  %s179_s9 = sand.u32 1, %s1038_s12  }
  0x17   : > { %s906_s11 = sshll.u32 %s187_s10, 2  ;;  %v206_v10 = vld [vmem:[%s1528_s0 + $0x80] sm:$0xff]  ;;  %v199_v16 = vld [vmem:[%s1528_s0 + $0x48] sm:$0xff]  ;;  %v233_v20 = vld [vmem:[%s1529_s1 + $0x50] sm:$0xff]  ;;  %s904_s10 = sshll.u32 %s179_s9, 8 }
  0x18   : > { %s189_s24 = scalar_lea.vmem %s1530_s2, %s906_s11  ;;  %v214_v11 = vld [vmem:[%s1528_s0 + $0xc0] sm:$0xff]  ;;  %v207_v17 = vld [vmem:[%s1528_s0 + $0x88] sm:$0xff]  ;;  %v192_v22 = vld [vmem:[%s1528_s0 + $0x10] sm:$0xff]  ;;  %s1386_s11 = scalar_lea.vmem [#allocation2], %s904_s10 }
  0x19   : > { %v222_v4 = vld [vmem:[%s189_s24] sm:$0xf]  ;;  %v215_v18 = vld [vmem:[%s1528_s0 + $0xc8] sm:$0xff]  ;;  %v200_v23 = vld [vmem:[%s1528_s0 + $0x50] sm:$0xff]  ;;  %s941_s12 = sshll.u32 (%p1131_p5), %s1050_s15, 6 }
  0x1a   : > { %907 = vmatpush.msk.msra.mxu0 %vm512_vm0, %v222_v4  ;;  %945 = vmatpush.msk.msra.mxu1 %vm512_vm0, %v222_v4  ;;  %v231_v12 = vld [vmem:[%s1529_s1 + $0x40] sm:$0xff]  ;;  %v232_v21 = vld [vmem:[%s1529_s1 + $0x48] sm:$0xff]  ;;  %v208_v24 = vld [vmem:[%s1528_s0 + $0x90] sm:$0xff]  ;;  %s669_s21 = sadd.s32 (%p1131_p5), %s1046_s14, %s941_s12 }
  0x1b   : > { %946 = vmatpush.msk.msra.mxu2 %vm512_vm0, %v222_v4  ;;  %947 = vmatpush.msk.msra.mxu3 %vm512_vm0, %v222_v4  ;;  %v216_v25 = vld [vmem:[%s1528_s0 + $0xd0] sm:$0xff]  ;;  %v236_v27 = vld [vmem:[%s1529_s1 + $0x68] sm:$0xff]  ;;  %v235_v28 = vld [vmem:[%s1529_s1 + $0x60] sm:$0xff]  ;;  %s942_s22 = sshll.u32 (%p1131_p5), %s669_s21, 3 }
  0x1c   : > { %908 = vmatmul.msk.f32.vlgmr.msra.gmra.mxu0 %vm415_vm1, %v190_v8  ;;  %916 = vmatmul.msk.f32.vlgmr.msra.gmra.mxu1 %vm415_vm1, %v198_v9  ;;  %v237_v26 = vld [vmem:[%s1529_s1 + $0x70] sm:$0xff]  ;;  %v193_v29 = vld [vmem:[%s1528_s0 + $0x18] sm:$0xff]  ;;  %v240_v33 = vld [vmem:[%s1529_s1 + $0x88] sm:$0xff]  ;;  %s1443_s23 = scalar_lea.vmem (%p1131_p5), %s1531_s3, %s942_s22 }
  0x1d   : > { %282 = vperm.xlu2 %1007, %v228_v5   ;;  %924 = vmatmul.msk.f32.vlgmr.msra.gmra.mxu2 %vm415_vm1, %v206_v10  ;;  %v201_v30 = vld [vmem:[%s1528_s0 + $0x58] sm:$0xff]  ;;  %v239_v34 = vld [vmem:[%s1529_s1 + $0x80] sm:$0xff]  ;;  %v241_v42 = vld [vmem:[%s1529_s1 + $0x90] sm:$0xff] }
  0x1e   : > { %272 = vperm.xlu1 %1006, %v226_v6   ;;  %262 = vperm.xlu0 %1005, %v224_v7   ;;  %v209_v31 = vld [vmem:[%s1528_s0 + $0x98] sm:$0xff]  ;;  %v194_v36 = vld [vmem:[%s1528_s0 + $0x20] sm:$0xff]  ;;  %v195_v43 = vld [vmem:[%s1528_s0 + $0x28] sm:$0xff] }
  0x1f   : > { %932 = vmatmul.msk.f32.vlgmr.msra.gmra.mxu3 %vm415_vm1, %v214_v11  ;;  %v217_v32 = vld [vmem:[%s1528_s0 + $0xd8] sm:$0xff]  ;;  %v202_v37 = vld [vmem:[%s1528_s0 + $0x60] sm:$0xff]  ;;  %v203_v44 = vld [vmem:[%s1528_s0 + $0x68] sm:$0xff] }
  0x20   : > { %v238_v35 = vld [vmem:[%s1529_s1 + $0x78] sm:$0xff]  ;;  %v210_v38 = vld [vmem:[%s1528_s0 + $0xa0] sm:$0xff]  ;;  %v211_v45 = vld [vmem:[%s1528_s0 + $0xa8] sm:$0xff] }
  0x21   : > { %v218_v39 = vld [vmem:[%s1528_s0 + $0xe0] sm:$0xff]  ;;  %v242_v41 = vld [vmem:[%s1529_s1 + $0x98] sm:$0xff]  ;;  %v219_v46 = vld [vmem:[%s1528_s0 + $0xe8] sm:$0xff] }
  0x22   : > { %v243_v40 = vld [vmem:[%s1529_s1 + $0xa0] sm:$0xff]  ;;  %v246_v47 = vld [vmem:[%s1529_s1 + $0xb8] sm:$0xff]  ;;  %v245_v48 = vld [vmem:[%s1529_s1 + $0xb0] sm:$0xff] }
  0x23   : > { %v244_v49 = vld [vmem:[%s1529_s1 + $0xa8] sm:$0xff]  ;;  %v196_v50 = vld [vmem:[%s1528_s0 + $0x30] sm:$0xff]  ;;  %v247_v56 = vld [vmem:[%s1529_s1 + $0xc0] sm:$0xff] }
  0x24   : > { %909 = vmatmul.msk.f32.gmra.mxu0 %vm415_vm1, %v191_v15  ;;  %917 = vmatmul.msk.f32.gmra.mxu1 %vm415_vm1, %v199_v16  ;;  %v204_v51 = vld [vmem:[%s1528_s0 + $0x70] sm:$0xff]  ;;  %v248_v55 = vld [vmem:[%s1529_s1 + $0xc8] sm:$0xff]  ;;  %v197_v57 = vld [vmem:[%s1528_s0 + $0x38] sm:$0xff] }
  0x25   : > { %297 = vperm.xlu2 %1007, %v231_v12   ;;  %925 = vmatmul.msk.f32.gmra.mxu2 %vm415_vm1, %v207_v17  ;;  %v212_v52 = vld [vmem:[%s1528_s0 + $0xb0] sm:$0xff]  ;;  %v205_v58 = vld [vmem:[%s1528_s0 + $0x78] sm:$0xff]  ;;  %v252_v61 = vld [vmem:[%s1529_s1 + $0xe8] sm:$0xff] }
  0x26   : > { %292 = vperm.xlu1 %1006, %v230_v13   ;;  %287 = vperm.xlu0 %1005, %v229_v14   ;;  %v220_v53 = vld [vmem:[%s1528_s0 + $0xf0] sm:$0xff]  ;;  %v213_v59 = vld [vmem:[%s1528_s0 + $0xb8] sm:$0xff]  ;;  %v251_v62 = vld [vmem:[%s1529_s1 + $0xe0] sm:$0xff] }
  0x27   : > { %933 = vmatmul.msk.f32.gmra.mxu3 %vm415_vm1, %v215_v18  ;;  %v249_v54 = vld [vmem:[%s1529_s1 + $0xd0] sm:$0xff]  ;;  %v221_v60 = vld [vmem:[%s1528_s0 + $0xf8] sm:$0xff] }
  0x28   : > { %v250_v63 = vld [vmem:[%s1529_s1 + $0xd8] sm:$0xff]  ;;  %v253_v1 = vld [vmem:[%s1529_s1 + $0xf0] sm:$0xff] }
  0x29   : > { %v254_v0 = vld [vmem:[%s1529_s1 + $0xf8] sm:$0xff] }
  0x2c   : > { %910 = vmatmul.msk.f32.gmra.mxu0 %vm415_vm1, %v192_v22  ;;  %918 = vmatmul.msk.f32.gmra.mxu1 %vm415_vm1, %v200_v23 }
  0x2d   : > { %312 = vperm.xlu2 %1007, %v234_v19   ;;  %926 = vmatmul.msk.f32.gmra.mxu2 %vm415_vm1, %v208_v24 }
  0x2e   : > { %307 = vperm.xlu1 %1006, %v233_v20   ;;  %302 = vperm.xlu0 %1005, %v232_v21  }
  0x2f   : > { %934 = vmatmul.msk.f32.gmra.mxu3 %vm415_vm1, %v216_v25 }
  0x34   : > { %911 = vmatmul.msk.f32.gmra.mxu0 %vm415_vm1, %v193_v29  ;;  %919 = vmatmul.msk.f32.gmra.mxu1 %vm415_vm1, %v201_v30 }
  0x35   : > { %327 = vperm.xlu2 %1007, %v237_v26   ;;  %927 = vmatmul.msk.f32.gmra.mxu2 %vm415_vm1, %v209_v31 }
  0x36   : > { %322 = vperm.xlu1 %1006, %v236_v27   ;;  %317 = vperm.xlu0 %1005, %v235_v28  }
  0x37   : > { %935 = vmatmul.msk.f32.gmra.mxu3 %vm415_vm1, %v217_v32 }
  0x3c   : > { %912 = vmatmul.msk.f32.gmra.mxu0 %vm415_vm1, %v194_v36  ;;  %920 = vmatmul.msk.f32.gmra.mxu1 %vm415_vm1, %v202_v37 }
  0x3d   : > { %342 = vperm.xlu2 %1007, %v240_v33   ;;  %928 = vmatmul.msk.f32.gmra.mxu2 %vm415_vm1, %v210_v38 }
  0x3e   : > { %337 = vperm.xlu1 %1006, %v239_v34   ;;  %332 = vperm.xlu0 %1005, %v238_v35  }
  0x3f   : > { %936 = vmatmul.msk.f32.gmra.mxu3 %vm415_vm1, %v218_v39 }
  0x44   : > { %913 = vmatmul.msk.f32.gmra.mxu0 %vm415_vm1, %v195_v43  ;;  %921 = vmatmul.msk.f32.gmra.mxu1 %vm415_vm1, %v203_v44 }
  0x45   : > { %357 = vperm.xlu2 %1007, %v243_v40   ;;  %929 = vmatmul.msk.f32.gmra.mxu2 %vm415_vm1, %v211_v45 }
  0x46   : > { %352 = vperm.xlu1 %1006, %v242_v41   ;;  %347 = vperm.xlu0 %1005, %v241_v42  }
  0x47   : > { %937 = vmatmul.msk.f32.gmra.mxu3 %vm415_vm1, %v219_v46 }
  0x4c   : > { %914 = vmatmul.msk.f32.gmra.mxu0 %vm415_vm1, %v196_v50  ;;  %922 = vmatmul.msk.f32.gmra.mxu1 %vm415_vm1, %v204_v51 }
  0x4d   : > { %372 = vperm.xlu2 %1007, %v246_v47   ;;  %930 = vmatmul.msk.f32.gmra.mxu2 %vm415_vm1, %v212_v52 }
  0x4e   : > { %367 = vperm.xlu1 %1006, %v245_v48   ;;  %362 = vperm.xlu0 %1005, %v244_v49  }
  0x4f   : > { %938 = vmatmul.msk.f32.gmra.mxu3 %vm415_vm1, %v220_v53 }
  0x54   : > { %915 = vmatmul.msk.f32.gmra.mxu0 %vm415_vm1, %v197_v57  ;;  %923 = vmatmul.msk.f32.gmra.mxu1 %vm415_vm1, %v205_v58 }
  0x55   : > { %387 = vperm.xlu2 %1007, %v249_v54   ;;  %931 = vmatmul.msk.f32.gmra.mxu2 %vm415_vm1, %v213_v59 }
  0x56   : > { %382 = vperm.xlu1 %1006, %v248_v55   ;;  %377 = vperm.xlu0 %1005, %v247_v56  }
  0x57   : > { %939 = vmatmul.msk.f32.gmra.mxu3 %vm415_vm1, %v221_v60 }
  0x5d   : > { %402 = vperm.xlu2 %1007, %v252_v61  }
  0x5e   : > { %397 = vperm.xlu1 %1006, %v251_v62   ;;  %392 = vperm.xlu0 %1005, %v250_v63  }
  0x66   : > { %412 = vperm.xlu1 %1006, %v254_v0   ;;  %407 = vperm.xlu0 %1005, %v253_v1  }
  0x6f   : > { %v1375_v2 = vpop.permute.xlu2 %277 }
  0x77   : > { %v1377_v3 = vpop.permute.xlu2 %282 }
  0x7f   : > { %v298_v4 = vpop.permute.xlu2 %297 }
  0x87   : > { %v313_v5 = vpop.permute.xlu2 %312 }
  0x88   : > { %v268_v6 = vpop.permute.xlu1 %267  ;;  %v258_v7 = vpop.permute.xlu0 %257 }
  0x8f   : > { %v1379_v8 = vpop.permute.xlu2 %327 }
  0x90   : > { %v273_v9 = vpop.permute.xlu1 %272  ;;  %v263_v10 = vpop.permute.xlu0 %262 }
  0x97   : > { %v343_v11 = vpop.permute.xlu2 %342 }
  0x98   : > { %v1382_v12 = vpop.permute.xlu1 %292  ;;  %v1384_v13 = vpop.permute.xlu0 %287 }
  0x99   : > { %v533_v14 = vpop.f32.mrf.mxu0  ;;  %v557_v16 = vpop.f32.mrf.mxu1 }
  0x9a   : > { %v534_v15 = vadd.f32 %v533_v14, %v258_v7  ;;  %v558_v17 = vadd.f32 %v557_v16, %v298_v4 }
  0x9c   : > { %629 = vst [vmem:[%s1386_s11] sm:$0xff] %v534_v15 }
  0x9d   : > { %637 = vst [vmem:[%s1386_s11 + $0x40] sm:$0xff] %v558_v17 }
  0x9f   : > { %v358_v18 = vpop.permute.xlu2 %357 }
  0xa0   : > { %v308_v19 = vpop.permute.xlu1 %307  ;;  %v303_v20 = vpop.permute.xlu0 %302 }
  0xa1   : > { %v581_v21 = vpop.f32.mrf.mxu2  ;;  %v536_v23 = vpop.f32.mrf.mxu0 }
  0xa2   : > { %v1390_v22 = vpop.f32.mrf.mxu3  ;;  %v537_v24 = vadd.f32 %v536_v23, %v263_v10  ;;  %v560_v25 = vpop.f32.mrf.mxu1 }
  0xa3   : > { %v561_v26 = vadd.f32 %v560_v25, %v303_v20 }
  0xa4   : > { %630 = vst [vmem:[%s1386_s11 + $0x8] sm:$0xff] %v537_v24 }
  0xa5   : > { %638 = vst [vmem:[%s1386_s11 + $0x48] sm:$0xff] %v561_v26 }
  0xa7   : > { %v1394_v27 = vpop.permute.xlu2 %372 }
  0xa8   : > { %v323_v28 = vpop.permute.xlu1 %322  ;;  %v318_v29 = vpop.permute.xlu0 %317 }
  0xa9   : > { %v584_v30 = vpop.f32.mrf.mxu2  ;;  %v539_v33 = vpop.f32.mrf.mxu0 }
  0xaa   : > { %v585_v31 = vadd.f32 %v584_v30, %v343_v11  ;;  %v608_v32 = vpop.f32.mrf.mxu3  ;;  %v540_v34 = vadd.f32 %v539_v33, %v268_v6  ;;  %v563_v35 = vpop.f32.mrf.mxu1 }
  0xab   : > { %v564_v36 = vadd.f32 %v563_v35, %v308_v19 }
  0xac   : > { %646 = vst [vmem:[%s1386_s11 + $0x88] sm:$0xff] %v585_v31 }
  0xad   : > { %631 = vst [vmem:[%s1386_s11 + $0x10] sm:$0xff] %v540_v34 }
  0xae   : > { %639 = vst [vmem:[%s1386_s11 + $0x50] sm:$0xff] %v564_v36 }
  0xaf   : > { %v388_v40 = vpop.permute.xlu2 %387 }
  0xb0   : > { %v338_v37 = vpop.permute.xlu1 %337  ;;  %v1399_v39 = vpop.permute.xlu0 %332 }
  0xb1   : > { %v582_v38 = vadd.f32 %v581_v21, %v338_v37  ;;  %v587_v41 = vpop.f32.mrf.mxu2  ;;  %v542_v43 = vpop.f32.mrf.mxu0 }
  0xb2   : > { %v611_v42 = vpop.f32.mrf.mxu3  ;;  %v543_v45 = vadd.f32 %v542_v43, %v273_v9  ;;  %v566_v46 = vpop.f32.mrf.mxu1  ;;  %v780_v43 = vld [vmem:[%s1386_s11 + $0x48] sm:$0xff] (%p1131_p5) }
  0xb3   : > { %645 = vst [vmem:[%s1386_s11 + $0x80] sm:$0xff] %v582_v38  ;;  %v612_v44 = vadd.f32 %v611_v42, %v388_v40  ;;  %v567_v47 = vadd.f32 %v566_v46, %v313_v5  ;;  %v778_v42 = vld [vmem:[%s1386_s11 + $0x40] sm:$0xff] (%p1131_p5) }
  0xb4   : > { %632 = vst [vmem:[%s1386_s11 + $0x18] sm:$0xff] %v543_v45  ;;  %v766_v36 = vld [vmem:[%s1386_s11 + $0x10] sm:$0xff] (%p1131_p5) }
  0xb5   : > { %655 = vst [vmem:[%s1386_s11 + $0xd0] sm:$0xff] %v612_v44  ;;  %v782_v44 = vld [vmem:[%s1386_s11 + $0x50] sm:$0xff] (%p1131_p5) }
  0xb6   : > { %640 = vst [vmem:[%s1386_s11 + $0x58] sm:$0xff] %v567_v47 }
  0xb7   : > { %v403_v9 = vpop.permute.xlu2 %402  ;;  %767 = vst [vmem:[%s1443_s23 + $0x20] sm:$0xff] (%p1131_p5), %v766_v36 }
  0xb8   : > { %v353_v48 = vpop.permute.xlu1 %352  ;;  %v348_v49 = vpop.permute.xlu0 %347  ;;  %779 = vst [vmem:[%s1443_s23 + $0x80] sm:$0xff] (%p1131_p5), %v778_v42 }
  0xb9   : > { %v588_v50 = vadd.f32 %v587_v41, %v348_v49  ;;  %v590_v51 = vpop.f32.mrf.mxu2  ;;  %v545_v54 = vpop.f32.mrf.mxu0  ;;  %781 = vst [vmem:[%s1443_s23 + $0x90] sm:$0xff] (%p1131_p5), %v780_v43 }
  0xba   : > { %v591_v52 = vadd.f32 %v590_v51, %v353_v48  ;;  %v614_v53 = vpop.f32.mrf.mxu3  ;;  %v546_v55 = vadd.f32 %v545_v54, %v1375_v2  ;;  %v569_v56 = vpop.f32.mrf.mxu1  ;;  %783 = vst [vmem:[%s1443_s23 + $0xa0] sm:$0xff] (%p1131_p5), %v782_v44  ;;  %v796_v51 = vld [vmem:[%s1386_s11 + $0x88] sm:$0xff] (%p1131_p5) }
  0xbb   : > { %647 = vst [vmem:[%s1386_s11 + $0x90] sm:$0xff] %v588_v50  ;;  %v570_v57 = vadd.f32 %v569_v56, %v318_v29  ;;  %v768_v37 = vld [vmem:[%s1386_s11 + $0x18] sm:$0xff] (%p1131_p5)  ;;  %v794_v50 = vld [vmem:[%s1386_s11 + $0x80] sm:$0xff] (%p1131_p5) }
  0xbc   : > { %648 = vst [vmem:[%s1386_s11 + $0x98] sm:$0xff] %v591_v52 }
  0xbd   : > { %633 = vst [vmem:[%s1386_s11 + $0x20] sm:$0xff] %v546_v55  ;;  %v784_v45 = vld [vmem:[%s1386_s11 + $0x58] sm:$0xff] (%p1131_p5) }
  0xbe   : > { %641 = vst [vmem:[%s1386_s11 + $0x60] sm:$0xff] %v570_v57 }
  0xbf   : > { %769 = vst [vmem:[%s1443_s23 + $0x30] sm:$0xff] (%p1131_p5), %v768_v37 }
  0xc0   : > { %v368_v58 = vpop.permute.xlu1 %367  ;;  %v363_v59 = vpop.permute.xlu0 %362  ;;  %785 = vst [vmem:[%s1443_s23 + $0xb0] sm:$0xff] (%p1131_p5), %v784_v45 }
  0xc1   : > { %v593_v60 = vpop.f32.mrf.mxu2  ;;  %v548_v63 = vpop.f32.mrf.mxu0  ;;  %795 = vst [vmem:[%s1443_s23 + $0x100] sm:$0xff] (%p1131_p5), %v794_v50 }
  0xc2   : > { %v594_v61 = vadd.f32 %v593_v60, %v358_v18  ;;  %v617_v62 = vpop.f32.mrf.mxu3  ;;  %v549_v0 = vadd.f32 %v548_v63, %v1377_v3  ;;  %v572_v1 = vpop.f32.mrf.mxu1  ;;  %v798_v52 = vld [vmem:[%s1386_s11 + $0x90] sm:$0xff] (%p1131_p5)  ;;  %797 = vst [vmem:[%s1443_s23 + $0x110] sm:$0xff] (%p1131_p5), %v796_v51 }
  0xc3   : > { %v573_v2 = vadd.f32 %v572_v1, %v323_v28  ;;  %799 = vst [vmem:[%s1443_s23 + $0x120] sm:$0xff] (%p1131_p5), %v798_v52  ;;  %v814_v60 = vld [vmem:[%s1386_s11 + $0xd0] sm:$0xff] (%p1131_p5) }
  0xc4   : > { %649 = vst [vmem:[%s1386_s11 + $0xa0] sm:$0xff] %v594_v61  ;;  %v770_v38 = vld [vmem:[%s1386_s11 + $0x20] sm:$0xff] (%p1131_p5) }
  0xc5   : > { %634 = vst [vmem:[%s1386_s11 + $0x28] sm:$0xff] %v549_v0  ;;  %v786_v46 = vld [vmem:[%s1386_s11 + $0x60] sm:$0xff] (%p1131_p5) }
  0xc6   : > { %642 = vst [vmem:[%s1386_s11 + $0x68] sm:$0xff] %v573_v2 }
  0xc7   : > { %771 = vst [vmem:[%s1443_s23 + $0x40] sm:$0xff] (%p1131_p5), %v770_v38 }
  0xc8   : > { %v383_v4 = vpop.permute.xlu1 %382  ;;  %v378_v6 = vpop.permute.xlu0 %377  ;;  %787 = vst [vmem:[%s1443_s23 + $0xc0] sm:$0xff] (%p1131_p5), %v786_v46 }
  0xc9   : > { %v609_v5 = vadd.f32 %v608_v32, %v383_v4  ;;  %v606_v7 = vadd.f32 %v1390_v22, %v378_v6  ;;  %v596_v10 = vpop.f32.mrf.mxu2  ;;  %v551_v14 = vpop.f32.mrf.mxu0  ;;  %815 = vst [vmem:[%s1443_s23 + $0x1a0] sm:$0xff] (%p1131_p5), %v814_v60 }
  0xca   : > { %v597_v3 = vadd.f32 %v596_v10, %v363_v59  ;;  %v620_v11 = vpop.f32.mrf.mxu3  ;;  %v552_v16 = vadd.f32 %v551_v14, %v1384_v13  ;;  %v575_v17 = vpop.f32.mrf.mxu1 }
  0xcb   : > { %654 = vst [vmem:[%s1386_s11 + $0xc8] sm:$0xff] %v609_v5  ;;  %v621_v15 = vadd.f32 %v620_v11, %v403_v9  ;;  %v576_v18 = vadd.f32 %v575_v17, %v1379_v8  ;;  %v802_v54 = vld [vmem:[%s1386_s11 + $0xa0] sm:$0xff] (%p1131_p5) }
  0xcc   : > { %653 = vst [vmem:[%s1386_s11 + $0xc0] sm:$0xff] %v606_v7 }
  0xcd   : > { %650 = vst [vmem:[%s1386_s11 + $0xa8] sm:$0xff] %v597_v3  ;;  %v788_v47 = vld [vmem:[%s1386_s11 + $0x68] sm:$0xff] (%p1131_p5) }
  0xce   : > { %658 = vst [vmem:[%s1386_s11 + $0xe8] sm:$0xff] %v621_v15 }
  0xcf   : > { %635 = vst [vmem:[%s1386_s11 + $0x30] sm:$0xff] %v552_v16 }
  0xd0   : > { %v398_v19 = vpop.permute.xlu1 %397  ;;  %643 = vst [vmem:[%s1386_s11 + $0x70] sm:$0xff] %v576_v18  ;;  %v393_v21 = vpop.permute.xlu0 %392 }
  0xd1   : > { %v618_v20 = vadd.f32 %v617_v62, %v398_v19  ;;  %v615_v22 = vadd.f32 %v614_v53, %v393_v21  ;;  %v599_v23 = vpop.f32.mrf.mxu2  ;;  %v554_v25 = vpop.f32.mrf.mxu0  ;;  %789 = vst [vmem:[%s1443_s23 + $0xd0] sm:$0xff] (%p1131_p5), %v788_v47  ;;  %v800_v53 = vld [vmem:[%s1386_s11 + $0x98] sm:$0xff] (%p1131_p5) }
  0xd2   : > { %v600_v24 = vadd.f32 %v599_v23, %v368_v58  ;;  %v623_v13 = vpop.f32.mrf.mxu3  ;;  %v555_v8 = vadd.f32 %v554_v25, %v1382_v12  ;;  %v578_v26 = vpop.f32.mrf.mxu1  ;;  %v762_v12 = vld [vmem:[%s1386_s11] sm:$0xff] (%p1131_p5)  ;;  %801 = vst [vmem:[%s1443_s23 + $0x130] sm:$0xff] (%p1131_p5), %v800_v53  ;;  %v812_v59 = vld [vmem:[%s1386_s11 + $0xc8] sm:$0xff] (%p1131_p5) }
  0xd3   : > { %657 = vst [vmem:[%s1386_s11 + $0xe0] sm:$0xff] %v618_v20  ;;  %v579_v28 = vadd.f32 %v578_v26, %v1399_v39  ;;  %v772_v39 = vld [vmem:[%s1386_s11 + $0x28] sm:$0xff] (%p1131_p5)  ;;  %v810_v58 = vld [vmem:[%s1386_s11 + $0xc0] sm:$0xff] (%p1131_p5) }
  0xd4   : > { %656 = vst [vmem:[%s1386_s11 + $0xd8] sm:$0xff] %v615_v22  ;;  %v804_v55 = vld [vmem:[%s1386_s11 + $0xa8] sm:$0xff] (%p1131_p5) }
  0xd5   : > { %651 = vst [vmem:[%s1386_s11 + $0xb0] sm:$0xff] %v600_v24  ;;  %v820_v63 = vld [vmem:[%s1386_s11 + $0xe8] sm:$0xff] (%p1131_p5) }
  0xd6   : > { %636 = vst [vmem:[%s1386_s11 + $0x38] sm:$0xff] %v555_v8  ;;  %v774_v40 = vld [vmem:[%s1386_s11 + $0x30] sm:$0xff] (%p1131_p5) }
  0xd7   : > { %644 = vst [vmem:[%s1386_s11 + $0x78] sm:$0xff] %v579_v28  ;;  %v790_v48 = vld [vmem:[%s1386_s11 + $0x70] sm:$0xff] (%p1131_p5) }
  0xd8   : > { %v408_v29 = vpop.permute.xlu0 %407  ;;  %v413_v30 = vpop.permute.xlu1 %412  ;;  %763 = vst [vmem:[%s1443_s23] sm:$0xff] (%p1131_p5), %v762_v12 }
  0xd9   : > { %v624_v31 = vadd.f32 %v623_v13, %v408_v29  ;;  %v602_v32 = vpop.f32.mrf.mxu2  ;;  %667 = sbr.rel (!%p1131_p5) target bundleno = 237 (0xed), region = 36  ;;  %773 = vst [vmem:[%s1443_s23 + $0x50] sm:$0xff] (%p1131_p5), %v772_v39 }
  0xda   : > { %v603_v33 = vadd.f32 %v602_v32, %v1394_v27  ;;  %v626_v34 = vpop.f32.mrf.mxu3  ;;  %v764_v27 = vld [vmem:[%s1386_s11 + $0x8] sm:$0xff] (%p1131_p5)  ;;  %775 = vst [vmem:[%s1443_s23 + $0x60] sm:$0xff] (%p1131_p5), %v774_v40  ;;  %v818_v62 = vld [vmem:[%s1386_s11 + $0xe0] sm:$0xff] (%p1131_p5) }
  0xdb   : > { %659 = vst [vmem:[%s1386_s11 + $0xf0] sm:$0xff] %v624_v31  ;;  %v627_v35 = vadd.f32 %v626_v34, %v413_v30  ;;  %v816_v61 = vld [vmem:[%s1386_s11 + $0xd8] sm:$0xff] (%p1131_p5) }
  0xdc   : > { %652 = vst [vmem:[%s1386_s11 + $0xb8] sm:$0xff] %v603_v33  ;;  %v806_v56 = vld [vmem:[%s1386_s11 + $0xb0] sm:$0xff] (%p1131_p5) }
  0xdd   : > { %660 = vst [vmem:[%s1386_s11 + $0xf8] sm:$0xff] %v627_v35  ;;  %v776_v41 = vld [vmem:[%s1386_s11 + $0x38] sm:$0xff] (%p1131_p5) }
  0xde   : > { %765 = vst [vmem:[%s1443_s23 + $0x10] sm:$0xff] %v764_v27  ;;  %v792_v49 = vld [vmem:[%s1386_s11 + $0x78] sm:$0xff] }
  0xdf   : > { %777 = vst [vmem:[%s1443_s23 + $0x70] sm:$0xff] %v776_v41 }
  0xe0   : > { %791 = vst [vmem:[%s1443_s23 + $0xe0] sm:$0xff] %v790_v48 }
  0xe1   : > { %793 = vst [vmem:[%s1443_s23 + $0xf0] sm:$0xff] %v792_v49 }
  0xe2   : > { %803 = vst [vmem:[%s1443_s23 + $0x140] sm:$0xff] %v802_v54  ;;  %v822_v0 = vld [vmem:[%s1386_s11 + $0xf0] sm:$0xff] }
  0xe3   : > { %v808_v57 = vld [vmem:[%s1386_s11 + $0xb8] sm:$0xff]  ;;  %805 = vst [vmem:[%s1443_s23 + $0x150] sm:$0xff] %v804_v55 }
  0xe4   : > { %807 = vst [vmem:[%s1443_s23 + $0x160] sm:$0xff] %v806_v56  ;;  %v824_v1 = vld [vmem:[%s1386_s11 + $0xf8] sm:$0xff] }
  0xe5   : > { %809 = vst [vmem:[%s1443_s23 + $0x170] sm:$0xff] %v808_v57 }
  0xe6   : > { %811 = vst [vmem:[%s1443_s23 + $0x180] sm:$0xff] %v810_v58 }
  0xe7   : > { %813 = vst [vmem:[%s1443_s23 + $0x190] sm:$0xff] %v812_v59 }
  0xe8   : > { %817 = vst [vmem:[%s1443_s23 + $0x1b0] sm:$0xff] %v816_v61 }
  0xe9   : > { %819 = vst [vmem:[%s1443_s23 + $0x1c0] sm:$0xff] %v818_v62 }
  0xea   : > { %821 = vst [vmem:[%s1443_s23 + $0x1d0] sm:$0xff] %v820_v63 }
  0xeb   : > { %823 = vst [vmem:[%s1443_s23 + $0x1e0] sm:$0xff] %v822_v0 }
  0xec   : > { %825 = vst [vmem:[%s1443_s23 + $0x1f0] sm:$0xff] %v824_v1 }
  0xed PF: > { %s13_s18 = sadd.s32 1, %s1062_s18   ;;  %s1533_s12 = smov %s1042_s13 }
  0xee   : > { %p10_p11 = scmp.ge.s32.totalorder %s13_s18, 6   ;;  %s1534_s13 = smov %s1142_s27 }
  0xef   : > { %s1535_s14 = smov %s1054_s16  ;;  %s1536_s15 = smov %s1058_s17 }
  0xf0   : > { %s1537_s16 = smov %s1540_s19  ;;  %s1538_s17 = smov %s1544_s20 }
  0xf1   :  { %12 = sbr.rel (!%p10_p11) target bundleno = 4 (0x4), region = 100 }

</bundles_post_ra>
